<compile_context>
chip_gen: v5e
topology: v5e:2x2
jax: 0.10.0
libtpu: 0.0.40
codegen_flags: <defaults>
</compile_context>

<pallas_src>
import jax
import jax.numpy as jnp
from jax import lax
from jax.experimental import pallas as pl
from jax.experimental.pallas import tpu as pltpu


_LN_EPS = 1e-5          # PyTorch LayerNorm default
_POOL_CHUNK = 8         # sublane chunk for the streaming spatial reduction


def _projection_kernel(feat_ref, w_ref, params_ref, out_ref):
    """One batch element per grid step.

    feat_ref   : (1, S, C)  bf16/f32   flattened spatial, channels on lanes
    w_ref      : (C, O)     bf16/f32   Linear weight, stored (in, out)
    params_ref : (3, O)     f32        rows = [bias, ln_gamma, ln_beta]
    out_ref    : (1, 1, O)  f32
    """
    S = feat_ref.shape[1]
    C = feat_ref.shape[2]

    # ---- AdaptiveAvgPool3d(1) + Flatten: streaming sum over spatial -------
    n_full = S // _POOL_CHUNK
    tail = S - n_full * _POOL_CHUNK
    acc = jnp.zeros((1, C), jnp.float32)

    if n_full > 0:
        def body(i, a):
            start = pl.multiple_of(i * _POOL_CHUNK, _POOL_CHUNK)
            blk = feat_ref[0, pl.ds(start, _POOL_CHUNK), :].astype(jnp.float32)
            return a + jnp.sum(blk, axis=0, keepdims=True)          # (1, C)
        acc = lax.fori_loop(0, n_full, body, acc, unroll=True)

    if tail > 0:
        blk = feat_ref[0, pl.ds(n_full * _POOL_CHUNK, tail), :].astype(jnp.float32)
        acc = acc + jnp.sum(blk, axis=0, keepdims=True)

    # ---- Linear(C, O): bf16 operands on the MXU, f32 accumulation ---------
    pooled = acc.astype(w_ref.dtype)                                 # (1, C)
    z = jnp.dot(pooled, w_ref[...],
                preferred_element_type=jnp.float32)                  # (1, O)
    z = z * jnp.float32(1.0 / S) + params_ref[0:1, :]                # mean + bias

    # ---- LayerNorm(O), eps = 1e-5 ------------------------------------------
    mu = jnp.mean(z, axis=-1, keepdims=True)
    var = jnp.mean((z - mu) ** 2, axis=-1, keepdims=True)
    zn = (z - mu) * lax.rsqrt(var + _LN_EPS)
    y = zn * params_ref[1:2, :] + params_ref[2:3, :]                 # (1, O)

    out_ref[...] = y[None].astype(out_ref.dtype)                     # (1, 1, O)


def mri_encoder_projection(features_cl, w, b, gamma, beta):
    """features_cl: (B, D, H, W, C) channels-last SwinViT stage-4 features
    (bf16 or f32).  w: (C, O) Linear weight (in, out).  Returns (B, 1, O)
    float32 == MRIEncoder3D.projection(features).unsqueeze(1)."""
    B = features_cl.shape[0]
    C = features_cl.shape[-1]
    S = 1
    for d in features_cl.shape[1:-1]:
        S *= d
    O = w.shape[1]

    feat = features_cl.reshape(B, S, C)                   # free view, no transpose
    params = jnp.stack([b, gamma, beta], axis=0).astype(jnp.float32)   # (3, O)

    return pl.pallas_call(
        _projection_kernel,
        out_shape=jax.ShapeDtypeStruct((B, 1, O), jnp.float32),
        grid=(B,),
        in_specs=[
            pl.BlockSpec((1, S, C), lambda bi: (bi, 0, 0)),  # per-batch feature tile
            pl.BlockSpec((C, O), lambda bi: (0, 0)),         # weight, resident
            pl.BlockSpec((3, O), lambda bi: (0, 0)),         # [bias; gamma; beta]
        ],
        out_specs=pl.BlockSpec((1, 1, O), lambda bi: (bi, 0, 0)),
        compiler_params=pltpu.CompilerParams(
            dimension_semantics=("parallel",)),
    )(feat, w, params)


def _reference(features_cl, w, b, gamma, beta):
    """Pure-JAX reference: AvgPool3d(1) -> Flatten -> Linear -> LayerNorm ->
    unsqueeze(1).  The pooled activations are rounded to the weight dtype
    before the matmul exactly as the kernel feeds the MXU (rounding point
    only; same math), so the comparison can use tight tolerances."""
    B = features_cl.shape[0]
    C = features_cl.shape[-1]
    feat = features_cl.reshape(B, -1, C).astype(jnp.float32)
    S = feat.shape[1]
    pooled_sum = jnp.sum(feat, axis=1)                                # (B, C)
    z = jnp.dot(pooled_sum.astype(w.dtype).astype(jnp.float32),
                w.astype(jnp.float32), precision="highest")
    z = z * (1.0 / S) + b
    mu = jnp.mean(z, axis=-1, keepdims=True)
    var = jnp.mean((z - mu) ** 2, axis=-1, keepdims=True)
    zn = (z - mu) * lax.rsqrt(var + _LN_EPS)
    return (zn * gamma + beta)[:, None, :]                            # (B, 1, O)


if __name__ == "__main__":
    key = jax.random.PRNGKey(0)
    # SwinViT stage-4 output for a 96^3 volume with feature_size=48:
    #   C = 48 * 16 = 768 channels, spatial = 96 / 32 = 3  ->  (B, 3, 3, 3, 768)
    #   emitted channels-last on TPU (avoids any NCDHW transpose).
    B, D, H, W, C = 2, 3, 3, 3, 768
    output_dim = 128  # small output_dim for the demo (module default is 512)

    k_feat, k_w, k_b = jax.random.split(key, 3)

    # TODO(synk): SwinUNETR.swinViT (MONAI 3D Swin Transformer backbone) has no
    # in-script Pallas equivalent; the kernel consumes its stage-4 feature map
    # directly and implements the projection head exactly.
    features = jax.random.normal(k_feat, (B, D, H, W, C), jnp.float32).astype(jnp.bfloat16)

    # PyTorch nn.Linear default init: U(-1/sqrt(in), +1/sqrt(in)); weight kept (in, out).
    bound = 1.0 / (C ** 0.5)
    w = jax.random.uniform(k_w, (C, output_dim), jnp.float32, -bound, bound).astype(jnp.bfloat16)
    b = jax.random.uniform(k_b, (output_dim,), jnp.float32, -bound, bound)
    gamma = jnp.ones((output_dim,), jnp.float32)   # LayerNorm weight
    beta = jnp.zeros((output_dim,), jnp.float32)   # LayerNorm bias

    out = jax.block_until_ready(mri_encoder_projection(features, w, b, gamma, beta))
    ref = _reference(features, w, b, gamma, beta)

    assert out.shape == (B, 1, output_dim), out.shape
    max_err = float(jnp.max(jnp.abs(out - ref)))
    assert jnp.allclose(out, ref, atol=2e-3, rtol=2e-3), max_err
    print("KERNEL_OK")
</pallas_src>

<mosaic_0001>
module attributes {stable_mosaic.version = 11 : i64} {
  func.func @_projection_kernel(%arg0: i32, %arg1: memref<1x27x768xbf16, #tpu.memory_space<vmem>>, %arg2: memref<768x128xbf16, #tpu.memory_space<vmem>>, %arg3: memref<3x128xf32, #tpu.memory_space<vmem>>, %arg4: memref<1x1x128xf32, #tpu.memory_space<vmem>>) attributes {dimension_semantics = [#tpu.dimension_semantics<parallel>], iteration_bounds = array<i64: 2>, scalar_prefetch = 0 : i64, scratch_operands = 0 : i64, tpu.core_type = #tpu.core_type<tc>, window_params = [{transform_indices = @transform_0, window_bounds = array<i64: 1, 27, 768>}, {pipeline_mode = #tpu.pipeline_mode<synchronous>, transform_indices = @transform_1, window_bounds = array<i64: 768, 128>}, {pipeline_mode = #tpu.pipeline_mode<synchronous>, transform_indices = @transform_2, window_bounds = array<i64: 3, 128>}, {transform_indices = @transform_3, window_bounds = array<i64: 1, 1, 128>}]} {
    %cst = arith.constant 0.000000e+00 : f32
    %0 = vector.broadcast %cst : f32 to vector<1x768xf32>
    %c0_i32 = arith.constant 0 : i32
    %c8_i32 = arith.constant 8 : i32
    %1 = arith.muli %c0_i32, %c8_i32 : i32
    %2 = tpu.assume_multiple %1, 8 : i32
    %c0 = arith.constant 0 : index
    %3 = arith.index_cast %2 : i32 to index
    %c0_0 = arith.constant 0 : index
    %4 = vector.load %arg1[%c0, %3, %c0_0] : memref<1x27x768xbf16, #tpu.memory_space<vmem>>, vector<1x8x768xbf16>
    %5 = vector.shape_cast %4 : vector<1x8x768xbf16> to vector<8x768xbf16>
    %6 = arith.extf %5 : vector<8x768xbf16> to vector<8x768xf32>
    %cst_1 = arith.constant dense<0.000000e+00> : vector<768xf32>
    %7 = vector.multi_reduction <add>, %6, %cst_1 [0] : vector<8x768xf32> to vector<768xf32>
    %8 = vector.shape_cast %7 : vector<768xf32> to vector<1x768xf32>
    %9 = arith.addf %0, %8 : vector<1x768xf32>
    %c1_i32 = arith.constant 1 : i32
    %c8_i32_2 = arith.constant 8 : i32
    %10 = arith.muli %c1_i32, %c8_i32_2 : i32
    %11 = tpu.assume_multiple %10, 8 : i32
    %c0_3 = arith.constant 0 : index
    %12 = arith.index_cast %11 : i32 to index
    %c0_4 = arith.constant 0 : index
    %13 = vector.load %arg1[%c0_3, %12, %c0_4] : memref<1x27x768xbf16, #tpu.memory_space<vmem>>, vector<1x8x768xbf16>
    %14 = vector.shape_cast %13 : vector<1x8x768xbf16> to vector<8x768xbf16>
    %15 = arith.extf %14 : vector<8x768xbf16> to vector<8x768xf32>
    %cst_5 = arith.constant dense<0.000000e+00> : vector<768xf32>
    %16 = vector.multi_reduction <add>, %15, %cst_5 [0] : vector<8x768xf32> to vector<768xf32>
    %17 = vector.shape_cast %16 : vector<768xf32> to vector<1x768xf32>
    %18 = arith.addf %9, %17 : vector<1x768xf32>
    %c2_i32 = arith.constant 2 : i32
    %c8_i32_6 = arith.constant 8 : i32
    %19 = arith.muli %c2_i32, %c8_i32_6 : i32
    %20 = tpu.assume_multiple %19, 8 : i32
    %c0_7 = arith.constant 0 : index
    %21 = arith.index_cast %20 : i32 to index
    %c0_8 = arith.constant 0 : index
    %22 = vector.load %arg1[%c0_7, %21, %c0_8] : memref<1x27x768xbf16, #tpu.memory_space<vmem>>, vector<1x8x768xbf16>
    %23 = vector.shape_cast %22 : vector<1x8x768xbf16> to vector<8x768xbf16>
    %24 = arith.extf %23 : vector<8x768xbf16> to vector<8x768xf32>
    %cst_9 = arith.constant dense<0.000000e+00> : vector<768xf32>
    %25 = vector.multi_reduction <add>, %24, %cst_9 [0] : vector<8x768xf32> to vector<768xf32>
    %26 = vector.shape_cast %25 : vector<768xf32> to vector<1x768xf32>
    %27 = arith.addf %18, %26 : vector<1x768xf32>
    %c3_i32 = arith.constant 3 : i32
    %c0_10 = arith.constant 0 : index
    %c24 = arith.constant 24 : index
    %c0_11 = arith.constant 0 : index
    %28 = vector.load %arg1[%c0_10, %c24, %c0_11] : memref<1x27x768xbf16, #tpu.memory_space<vmem>>, vector<1x3x768xbf16>
    %29 = vector.shape_cast %28 : vector<1x3x768xbf16> to vector<3x768xbf16>
    %30 = arith.extf %29 : vector<3x768xbf16> to vector<3x768xf32>
    %cst_12 = arith.constant dense<0.000000e+00> : vector<768xf32>
    %31 = vector.multi_reduction <add>, %30, %cst_12 [0] : vector<3x768xf32> to vector<768xf32>
    %32 = vector.shape_cast %31 : vector<768xf32> to vector<1x768xf32>
    %33 = arith.addf %27, %32 : vector<1x768xf32>
    %34 = arith.truncf %33 : vector<1x768xf32> to vector<1x768xbf16>
    %c0_13 = arith.constant 0 : index
    %c0_14 = arith.constant 0 : index
    %35 = vector.load %arg2[%c0_13, %c0_14] : memref<768x128xbf16, #tpu.memory_space<vmem>>, vector<768x128xbf16>
    %cst_15 = arith.constant dense<0.000000e+00> : vector<1x128xf32>
    %36 = tpu.matmul %34, %35, %cst_15 {dimension_numbers = #tpu.dot_dimension_numbers<[1], [0], [0], [1], [0, 0, 1, 1], [], []>} : vector<1x768xbf16>, vector<768x128xbf16>, vector<1x128xf32> -> vector<1x128xf32>
    %cst_16 = arith.constant 0.0370370373 : f32
    %37 = vector.broadcast %cst_16 : f32 to vector<1x128xf32>
    %38 = arith.mulf %36, %37 : vector<1x128xf32>
    %c0_17 = arith.constant 0 : index
    %c0_18 = arith.constant 0 : index
    %39 = vector.load %arg3[%c0_17, %c0_18] : memref<3x128xf32, #tpu.memory_space<vmem>>, vector<1x128xf32>
    %40 = arith.addf %38, %39 : vector<1x128xf32>
    %cst_19 = arith.constant dense<0.000000e+00> : vector<1xf32>
    %41 = vector.multi_reduction <add>, %40, %cst_19 [1] : vector<1x128xf32> to vector<1xf32>
    %42 = vector.shape_cast %41 : vector<1xf32> to vector<1x1xf32>
    %cst_20 = arith.constant 1.280000e+02 : f32
    %43 = vector.broadcast %cst_20 : f32 to vector<1x1xf32>
    %44 = arith.divf %42, %43 : vector<1x1xf32>
    %45 = vector.broadcast %44 : vector<1x1xf32> to vector<1x128xf32>
    %46 = arith.subf %40, %45 : vector<1x128xf32>
    %47 = arith.mulf %46, %46 : vector<1x128xf32>
    %cst_21 = arith.constant dense<0.000000e+00> : vector<1xf32>
    %48 = vector.multi_reduction <add>, %47, %cst_21 [1] : vector<1x128xf32> to vector<1xf32>
    %49 = vector.shape_cast %48 : vector<1xf32> to vector<1x1xf32>
    %cst_22 = arith.constant 1.280000e+02 : f32
    %50 = vector.broadcast %cst_22 : f32 to vector<1x1xf32>
    %51 = arith.divf %49, %50 : vector<1x1xf32>
    %52 = vector.broadcast %44 : vector<1x1xf32> to vector<1x128xf32>
    %53 = arith.subf %40, %52 : vector<1x128xf32>
    %cst_23 = arith.constant 9.99999974E-6 : f32
    %54 = vector.broadcast %cst_23 : f32 to vector<1x1xf32>
    %55 = arith.addf %51, %54 : vector<1x1xf32>
    %56 = math.rsqrt %55 : vector<1x1xf32>
    %57 = vector.broadcast %56 : vector<1x1xf32> to vector<1x128xf32>
    %58 = arith.mulf %53, %57 : vector<1x128xf32>
    %c1 = arith.constant 1 : index
    %c0_24 = arith.constant 0 : index
    %59 = vector.load %arg3[%c1, %c0_24] : memref<3x128xf32, #tpu.memory_space<vmem>>, vector<1x128xf32>
    %60 = arith.mulf %58, %59 : vector<1x128xf32>
    %c2 = arith.constant 2 : index
    %c0_25 = arith.constant 0 : index
    %61 = vector.load %arg3[%c2, %c0_25] : memref<3x128xf32, #tpu.memory_space<vmem>>, vector<1x128xf32>
    %62 = arith.addf %60, %61 : vector<1x128xf32>
    %63 = vector.shape_cast %62 : vector<1x128xf32> to vector<1x1x128xf32>
    %c0_26 = arith.constant 0 : index
    %c0_27 = arith.constant 0 : index
    %c0_28 = arith.constant 0 : index
    %64 = vector.load %arg4[%c0_26, %c0_27, %c0_28] : memref<1x1x128xf32, #tpu.memory_space<vmem>>, vector<1x1x128xf32>
    tpu.vector_store %arg4[%c0_26, %c0_27, %c0_28], %63 {strides = array<i32>} : memref<1x1x128xf32, #tpu.memory_space<vmem>>, vector<1x1x128xf32>,
    return
  }
  func.func @transform_0(%arg0: i32) -> (i32, i32, i32) {
    %c0_i32 = arith.constant 0 : i32
    %c0_i32_0 = arith.constant 0 : i32
    %c0_i32_1 = arith.constant 0 : i32
    return %arg0, %c0_i32, %c0_i32_0 : i32, i32, i32
  }
  func.func @transform_1(%arg0: i32) -> (i32, i32) {
    %c0_i32 = arith.constant 0 : i32
    %c0_i32_0 = arith.constant 0 : i32
    %c0_i32_1 = arith.constant 0 : i32
    return %c0_i32, %c0_i32_0 : i32, i32
  }
  func.func @transform_2(%arg0: i32) -> (i32, i32) {
    %c0_i32 = arith.constant 0 : i32
    %c0_i32_0 = arith.constant 0 : i32
    %c0_i32_1 = arith.constant 0 : i32
    return %c0_i32, %c0_i32_0 : i32, i32
  }
  func.func @transform_3(%arg0: i32) -> (i32, i32, i32) {
    %c0_i32 = arith.constant 0 : i32
    %c0_i32_0 = arith.constant 0 : i32
    %c0_i32_1 = arith.constant 0 : i32
    return %arg0, %c0_i32, %c0_i32_0 : i32, i32, i32
  }
}

</mosaic_0001>

<bundles_post_ra>
// kernel: tpu_custom_call.1
= control target key start
LH: loop header
LB: loop body
LE: loop exit
PB: predicated region body
PF: predicated region fallthrough
CT: control target
= control target key end

     0   :  { %8 = vsyncpa [#allocation3], 0  ;;  %s1586_s0 = inlined_call_operand.vmem [shape: bf16[2,27,768], index: 0, kind: input, shape index: {}]   ;;  %s1587_s1 = inlined_call_operand.hbm [shape: bf16[768,128], index: 1, kind: input, shape index: {}]   ;;  %s1588_s2 = inlined_call_operand.vmem [shape: f32[3,128], index: 2, kind: input, shape index: {}]   ;;  %s1589_s3 = inlined_call_operand.hbm [shape: f32[2,1,128], index: 3, kind: output, shape index: {}]  }
   0x1   :  { %9 = vsyncpa [#allocation4], 0 }
   0x2   :  { %11 = vsyncpa [#allocation4 + $0x1], 0  ;;  %s1428_s12 = smov 0   ;;  %s1430_s13 = smov 0  }
   0x3   :  { %s1432_s14 = smov 0   ;;  %s1434_s15 = smov 0  }
   0x4 LB: > { %s1449_s16 = sadd.s32 4294967295, %s1402_s15   ;;  %s993_s17 = sadd.s32 4294967294, %s1402_s15   ;;  %s1402_s15 = sphi %s1434_s15, %s1595_s15   ;;  %s1398_s14 = sphi %s1432_s14, %s1594_s14   ;;  %s1394_s13 = sphi %s1430_s13, %s1593_s13   ;;  %s1390_s12 = sphi %s1428_s12, %s1592_s12  }
   0x5   : > { %s1453_s18 = sadd.s32 1, %s1402_s15   ;;  %s92_s19 = sadd.s32 1, %s1398_s14 }
   0x6   : > { %s89_s20 = ssub.s32 %s1402_s15, %s1453_s18  ;;  %p102_p0 = scmp.ne.s32.totalorder %s1398_s14, %s1394_s13 }
   0x7   : > { %p90_p1 = scmp.eq.s32.totalorder %s89_s20, 0  ;;  %p103_p2 = scmp.eq.s32.totalorder %s1449_s16, 1 }
   0x8   : > { %p108_p3 = scmp.ne.s32.totalorder %s1394_s13, %s1390_s12  ;;  %p109_p4 = scmp.eq.s32.totalorder %s993_s17, 1 }
   0x9   : > { %s1464_s21 = scalar_select %p90_p1, %s1398_s14, %s92_s19  }
   0xa   : > { %p1466_p5 = por %p103_p2, %p102_p0  ;;  %p1470_p6 = por %p109_p4, %p108_p3 }
   0xb   : > { %p994_p7 = scmp.ge.s32.totalorder %s1402_s15, 1  ;;  %p116_p8 = scmp.lt.s32.totalorder %s1402_s15, 3 }
   0xc   : > { %p1263_p9 = scmp.eq.s32.totalorder %s1449_s16, 0  ;;  %s127_s26 = sshll.u32 %s1587_s1, 4  ;;  %s128_s26 = int_to_ptr.hbm [resolvable:$true] %s127_s26 }
   0xd   : > { %p117_p10 = pnand %p994_p7, %p116_p8  ;;  %s1404_s27 = smov [#allocation2]  }
   0xe   : > { %s129_s28 = sshll.u32 %s1404_s27, 4  ;;  %s1405_s29 = smov 64   ;;  %s130_s28 = int_to_ptr.vmem [resolvable:$true] %s129_s28 }
   0xf   : > { %p1255_p11 = pneg %p117_p10  ;;  %s1406_s30 = smov 4  }
  0x10   : > { %156 = sbr.rel (%p117_p10) target bundleno = 494 (0x1ee), region = 32 }
  0x11   : > { %p1256_p12 = pnand %p1263_p9, %p1255_p11 }
  0x13   : > { %1258 = dma.hbm_to_vmem [thread:$0]  (!%p1256_p12), %s128_s26, 6144, %s130_s28, [#allocation3], %s1405_s29, %s1405_s29, %s1406_s30  }
  0x15   : > { %1381 = dma.done.wait (%p1263_p9), [#allocation3], 6144  }
  0x16   : > { %1383 = vsyncadd (%p1263_p9), [#allocation3], 4294961152  ;;  %p180_p13 = scmp.lt.s32.totalorder %s1449_s16, 1  ;;  %v1207_v0 = vld [vmem:[#allocation2 + $0x38] sm:$0xff]  ;;  %v1206_v2 = vld [vmem:[#allocation2 + $0x30] sm:$0xff]  ;;  %vm356_vm0 = vcmask 1042432   ;;  %s920_s20 = scalar_lea.hbm %s1589_s3, %s1449_s16 }
  0x17   : > { %v1215_v1 = vld [vmem:[#allocation2 + $0x78] sm:$0xff]  ;;  %795 = vmatpush.bf16.msra.mxu0 %v1207_v0  ;;  %v1214_v3 = vld [vmem:[#allocation2 + $0x70] sm:$0xff]  ;;  %v1205_v8 = vld [vmem:[#allocation2 + $0x28] sm:$0xff]  ;;  %vm876_vm1 = vcmask 1040384   ;;  %s178_s11 = sand.u32 1, %s1394_s13   ;;  %s924_s30 = sshll.u32 %s920_s20, 4  ;;  %s925_s30 = int_to_ptr.hbm [resolvable:$true] %s924_s30 }
  0x18   : > { %s181_s4 = scalar_select %p180_p13, %s1449_s16, 1  ;;  %808 = vmatpush.bf16.msra.mxu1 %v1215_v1  ;;  %v1223_v4 = vld [vmem:[#allocation2 + $0xb8] sm:$0xff]  ;;  %v1222_v6 = vld [vmem:[#allocation2 + $0xb0] sm:$0xff]  ;;  %v1213_v9 = vld [vmem:[#allocation2 + $0x68] sm:$0xff] }
  0x19   : > { %v1231_v5 = vld [vmem:[#allocation2 + $0xf8] sm:$0xff]  ;;  %821 = vmatpush.bf16.msra.mxu2 %v1223_v4  ;;  %v1230_v7 = vld [vmem:[#allocation2 + $0xf0] sm:$0xff]  ;;  %v1221_v10 = vld [vmem:[#allocation2 + $0xa8] sm:$0xff]  ;;  %s179_s28 = scalar_lea.vmem [#allocation5], %s178_s11  ;;  %s912_s16 = scalar_lea.sflag [#allocation4], %s178_s11 }
  0x1a   : > { %834 = vmatpush.bf16.msra.mxu3 %v1231_v5  ;;  %s1248_s5 = smul.u32 96, %s181_s4  ;;  %v1229_v11 = vld [vmem:[#allocation2 + $0xe8] sm:$0xff]  ;;  %v1204_v12 = vld [vmem:[#allocation2 + $0x20] sm:$0xff]  ;;  %v1203_v28 = vld [vmem:[#allocation2 + $0x18] sm:$0xff]  ;;  %s922_s29 = sshll.u32 %s179_s28, 4  ;;  %s923_s29 = int_to_ptr.vmem [resolvable:$true] %s922_s29 }
  0x1b   : > { %796 = vmatpush.bf16.msra.mxu0 %v1206_v2  ;;  %v1212_v13 = vld [vmem:[#allocation2 + $0x60] sm:$0xff]  ;;  %v1211_v29 = vld [vmem:[#allocation2 + $0x58] sm:$0xff]  ;;  %v1202_v48 = vld [vmem:[#allocation2 + $0x10] sm:$0xff]  ;;  %s1350_s4 = sshra.s32 %s925_s30, 4  ;;  %s1351_s4 = int_to_ptr.hbm [resolvable:$true] %s1350_s4 }
  0x1c   : > { %809 = vmatpush.bf16.msra.mxu1 %v1214_v3  ;;  %s1491_s8 = scalar_lea.vmem %s1586_s0, %s1248_s5  ;;  %v1220_v14 = vld [vmem:[#allocation2 + $0xa0] sm:$0xff]  ;;  %v1219_v38 = vld [vmem:[#allocation2 + $0x98] sm:$0xff]  ;;  %v1210_v49 = vld [vmem:[#allocation2 + $0x50] sm:$0xff]  ;;  %s1352_s5 = scalar_lea.hbm %s1351_s4, 1 }
  0x1d   : > { %822 = vmatpush.bf16.msra.mxu2 %v1222_v6  ;;  %v188_v15 = vld [vmem:[%s1491_s8] sm:$0xff]  ;;  %v1000_v16 = vld [vmem:[%s1491_s8 + $0x18] sm:$0xff]  ;;  %v1003_v20 = vld [vmem:[%s1491_s8 + $0x30] sm:$0xff]  ;;  %p1353_p0 = scmp.ne.s32.totalorder %s1351_s4, %s1352_s5  ;;  %p1357_p3 = scmp.lt.s32.totalorder %s1351_s4, %s1589_s3 }
  0x1e   : > { %835 = vmatpush.bf16.msra.mxu3 %v1230_v7  ;;  %v1228_v17 = vld [vmem:[#allocation2 + $0xe0] sm:$0xff]  ;;  %v191_v18 = vunpack.c.l.bf16 %v188_v15  ;;  %v245_v19 = vunpack.c.l.bf16 %v1000_v16  ;;  %v347_v21 = vld [vmem:[%s1491_s8 + $0x48] sm:$0x33]  ;;  %v192_v22 = vunpack.c.h.bf16 %v188_v15  ;;  %v246_v23 = vunpack.c.h.bf16 %v1000_v16  ;;  %v1227_v39 = vld [vmem:[#allocation2 + $0xd8] sm:$0xff] }
  0x1f   : > { %797 = vmatpush.bf16.msra.mxu0 %v1205_v8  ;;  %v299_v24 = vunpack.c.l.bf16 %v1003_v20  ;;  %v350_v25 = vunpack.c.l.bf16 %v347_v21  ;;  %v300_v26 = vunpack.c.h.bf16 %v1003_v20  ;;  %v351_v27 = vunpack.c.h.bf16 %v347_v21  ;;  %v1218_v58 = vld [vmem:[#allocation2 + $0x90] sm:$0xff]  ;;  %v1201_v4 = vld [vmem:[#allocation2 + $0x8] sm:$0xff]  ;;  %v1503_v16 = vld [vmem:[%s1491_s8 + $0x20] sm:$0xff]  ;;  %p1354_p1 = pnand %p1353_p0, %p1466_p5 }
  0x20   : > { %810 = vmatpush.bf16.msra.mxu1 %v1213_v9  ;;  %v197_v30 = vrot.slane %v191_v18, 4  ;;  %v251_v31 = vrot.slane %v245_v19, 4  ;;  %v203_v32 = vrot.slane %v192_v22, 4  ;;  %v257_v33 = vrot.slane %v246_v23, 4  ;;  %v1226_v59 = vld [vmem:[#allocation2 + $0xd0] sm:$0xff]  ;;  %v1209_v5 = vld [vmem:[#allocation2 + $0x48] sm:$0xff] }
  0x21   : > { %823 = vmatpush.bf16.msra.mxu2 %v1221_v10  ;;  %v305_v34 = vrot.slane %v299_v24, 4  ;;  %v357_v35 = vsel %vm356_vm0, %v350_v25, 0.0  ;;  %v311_v36 = vrot.slane %v300_v26, 4  ;;  %v364_v37 = vsel %vm356_vm0, %v351_v27, 0.0  ;;  %v1217_v10 = vld [vmem:[#allocation2 + $0x88] sm:$0xff]  ;;  %p1355_p2 = pneg %p1354_p1 }
  0x22   : > { %836 = vmatpush.bf16.msra.mxu3 %v1229_v11  ;;  %v198_v40 = vadd.f32 %v197_v30, %v191_v18  ;;  %v252_v41 = vadd.f32 %v251_v31, %v245_v19  ;;  %v358_v42 = vrot.slane %v357_v35, 4  ;;  %v204_v43 = vadd.f32 %v203_v32, %v192_v22  ;;  %v1500_v15 = vld [vmem:[%s1491_s8 + $0x8] sm:$0xff]  ;;  %v1506_v22 = vld [vmem:[%s1491_s8 + $0x38] sm:$0xff] }
  0x23   : > { %798 = vmatpush.bf16.msra.mxu0 %v1204_v12  ;;  %v306_v44 = vadd.f32 %v305_v34, %v299_v24  ;;  %v258_v45 = vadd.f32 %v257_v33, %v246_v23  ;;  %v312_v46 = vadd.f32 %v311_v36, %v300_v26  ;;  %v365_v47 = vrot.slane %v364_v37, 4  ;;  %v1509_v23 = vld [vmem:[%s1491_s8 + $0x50] sm:$0x33]  ;;  %v1239_v34 = vld [vmem:[#allocation2 + $0x138] sm:$0xff] }
  0x24   : > { %811 = vmatpush.bf16.msra.mxu1 %v1212_v13  ;;  %v199_v50 = vrot.slane %v198_v40, 2  ;;  %v253_v51 = vrot.slane %v252_v41, 2  ;;  %v359_v52 = vadd.f32 %v358_v42, %v357_v35  ;;  %v205_v53 = vrot.slane %v204_v43, 2  ;;  %v1247_v35 = vld [vmem:[#allocation2 + $0x178] sm:$0xff]  ;;  %v1224_v42 = vld [vmem:[#allocation2 + $0xc0] sm:$0xff] }
  0x25   : > { %824 = vmatpush.bf16.msra.mxu2 %v1220_v14  ;;  %v307_v54 = vrot.slane %v306_v44, 2  ;;  %v259_v55 = vrot.slane %v258_v45, 2  ;;  %v313_v56 = vrot.slane %v312_v46, 2  ;;  %v366_v57 = vadd.f32 %v365_v47, %v364_v37 }
  0x26   : > { %837 = vmatpush.bf16.msra.mxu3 %v1228_v17  ;;  %v200_v60 = vadd.f32 %v199_v50, %v198_v40  ;;  %v254_v61 = vadd.f32 %v253_v51, %v252_v41  ;;  %v360_v62 = vrot.slane %v359_v52, 2  ;;  %v206_v63 = vadd.f32 %v205_v53, %v204_v43  ;;  %v1225_v17 = vld [vmem:[#allocation2 + $0xc8] sm:$0xff]  ;;  %v1216_v41 = vld [vmem:[#allocation2 + $0x80] sm:$0xff] }
  0x27   : > { %799 = vmatpush.bf16.msra.mxu0 %v1203_v28  ;;  %v308_v0 = vadd.f32 %v307_v54, %v306_v44  ;;  %v260_v1 = vadd.f32 %v259_v55, %v258_v45  ;;  %v314_v2 = vadd.f32 %v313_v56, %v312_v46  ;;  %v367_v3 = vrot.slane %v366_v57, 2  ;;  %v1200_v28 = vld [vmem:[#allocation2] sm:$0xff]  ;;  %v1238_v54 = vld [vmem:[#allocation2 + $0x130] sm:$0xff] }
  0x28   : > { %812 = vmatpush.bf16.msra.mxu1 %v1211_v29  ;;  %v201_v6 = vrot.slane %v200_v60, 1  ;;  %v255_v7 = vrot.slane %v254_v61, 1  ;;  %v361_v8 = vadd.f32 %v360_v62, %v359_v52  ;;  %v207_v9 = vrot.slane %v206_v63, 1  ;;  %v1208_v29 = vld [vmem:[#allocation2 + $0x40] sm:$0xff]  ;;  %v1246_v55 = vld [vmem:[#allocation2 + $0x170] sm:$0xff] }
  0x29   : > { %825 = vmatpush.bf16.msra.mxu2 %v1219_v38  ;;  %v309_v11 = vrot.slane %v308_v0, 1  ;;  %v261_v12 = vrot.slane %v260_v1, 1  ;;  %v315_v13 = vrot.slane %v314_v2, 1  ;;  %v368_v14 = vadd.f32 %v367_v3, %v366_v57 }
  0x2a   : > { %838 = vmatpush.bf16.msra.mxu3 %v1227_v39  ;;  %v202_v18 = vadd.f32 %v201_v6, %v200_v60  ;;  %v256_v19 = vadd.f32 %v255_v7, %v254_v61  ;;  %v362_v20 = vrot.slane %v361_v8, 1  ;;  %v208_v21 = vadd.f32 %v207_v9, %v206_v63  ;;  %v1245_v9 = vld [vmem:[#allocation2 + $0x168] sm:$0xff] }
  0x2b   : > { %800 = vmatpush.bf16.msra.mxu0 %v1202_v48  ;;  %v310_v24 = vadd.f32 %v309_v11, %v308_v0  ;;  %v262_v25 = vadd.f32 %v261_v12, %v260_v1  ;;  %v316_v26 = vadd.f32 %v315_v13, %v314_v2  ;;  %v369_v27 = vrot.slane %v368_v14, 1 }
  0x2c   : > { %813 = vmatpush.bf16.msra.mxu1 %v1210_v49  ;;  %v287_v30 = vadd.f32 %v256_v19, %v202_v18  ;;  %v363_v31 = vadd.f32 %v362_v20, %v361_v8  ;;  %v193_v32 = vunpack.c.l.bf16 %v1500_v15  ;;  %v247_v33 = vunpack.c.l.bf16 %v1503_v16  ;;  %v1237_v8 = vld [vmem:[#allocation2 + $0x128] sm:$0xff] }
  0x2d   : > { %826 = vmatpush.bf16.msra.mxu2 %v1218_v58  ;;  %v288_v36 = vadd.f32 %v262_v25, %v208_v21  ;;  %v370_v37 = vadd.f32 %v369_v27, %v368_v14  ;;  %v301_v38 = vunpack.c.l.bf16 %v1506_v22  ;;  %v352_v39 = vunpack.c.l.bf16 %v1509_v23 }
  0x2e   : > { %839 = vmatpush.bf16.msra.mxu3 %v1226_v59  ;;  %v341_v40 = vadd.f32 %v310_v24, %v287_v30  ;;  %v209_v43 = vrot.slane %v193_v32, 4  ;;  %v263_v44 = vrot.slane %v247_v33, 4  ;;  %v194_v45 = vunpack.c.h.bf16 %v1500_v15  ;;  %v1244_v30 = vld [vmem:[#allocation2 + $0x160] sm:$0xff] }
  0x2f   : > { %801 = vmatpush.bf16.msra.mxu0 %v1201_v4  ;;  %v342_v46 = vadd.f32 %v316_v26, %v288_v36  ;;  %v317_v47 = vrot.slane %v301_v38, 4  ;;  %v371_v48 = vsel %vm356_vm0, %v352_v39, 0.0  ;;  %v248_v49 = vunpack.c.h.bf16 %v1503_v16  ;;  %v1532_v39 = vld [vmem:[%s1491_s8 + $0x58] sm:$0x33] }
  0x30   : > { %814 = vmatpush.bf16.msra.mxu1 %v1209_v5  ;;  %v399_v50 = vadd.f32 %v363_v31, %v341_v40  ;;  %v210_v51 = vadd.f32 %v209_v43, %v193_v32  ;;  %v264_v52 = vadd.f32 %v263_v44, %v247_v33  ;;  %v372_v53 = vrot.slane %v371_v48, 4 }
  0x31   : > { %827 = vmatpush.bf16.msra.mxu2 %v1217_v10  ;;  %v400_v56 = vadd.f32 %v370_v37, %v342_v46  ;;  %v318_v57 = vadd.f32 %v317_v47, %v301_v38  ;;  %v215_v58 = vrot.slane %v194_v45, 4  ;;  %v269_v59 = vrot.slane %v248_v49, 4 }
  0x32   : > { %840 = vmatpush.bf16.msra.mxu3 %v1225_v17  ;;  %v405_v60 = vpack.c.bf16 %v399_v50, %v399_v50  ;;  %v211_v61 = vrot.slane %v210_v51, 2  ;;  %v265_v62 = vrot.slane %v264_v52, 2  ;;  %v373_v63 = vadd.f32 %v372_v53, %v371_v48  ;;  %v1235_v50 = vld [vmem:[#allocation2 + $0x118] sm:$0xff] }
  0x33   : > { %802 = vmatpush.bf16.msra.mxu0 %v1200_v28  ;;  %v406_v0 = vpack.c.bf16 %v400_v56, %v400_v56  ;;  %v319_v1 = vrot.slane %v318_v57, 2  ;;  %v216_v2 = vadd.f32 %v215_v58, %v194_v45  ;;  %v270_v3 = vadd.f32 %v269_v59, %v248_v49  ;;  %v1525_v28 = vld [vmem:[%s1491_s8 + $0x28] sm:$0xff] }
  0x34   : > { %815 = vmatpush.bf16.msra.mxu1 %v1208_v29  ;;  %v212_v4 = vadd.f32 %v211_v61, %v210_v51  ;;  %v266_v5 = vadd.f32 %v265_v62, %v264_v52  ;;  %v374_v6 = vrot.slane %v373_v63, 2  ;;  %v302_v7 = vunpack.c.h.bf16 %v1506_v22  ;;  %v1522_v22 = vld [vmem:[%s1491_s8 + $0x10] sm:$0xff]  ;;  %v1236_v29 = vld [vmem:[#allocation2 + $0x120] sm:$0xff]  ;;  %v1243_v51 = vld [vmem:[#allocation2 + $0x158] sm:$0xff] }
  0x35   : > { %828 = vmatpush.bf16.msra.mxu2 %v1216_v41  ;;  %v320_v10 = vadd.f32 %v319_v1, %v318_v57  ;;  %v217_v11 = vrot.slane %v216_v2, 2  ;;  %v271_v12 = vrot.slane %v270_v3, 2  ;;  %v353_v13 = vunpack.c.h.bf16 %v1509_v23 }
  0x36   : > { %841 = vmatpush.bf16.msra.mxu3 %v1224_v42  ;;  %803 = vmatmul.bf16.vlgmr.msra.gmra.mxu0 %v405_v60  ;;  %v213_v14 = vrot.slane %v212_v4, 1  ;;  %v267_v15 = vrot.slane %v266_v5, 1  ;;  %v375_v16 = vadd.f32 %v374_v6, %v373_v63  ;;  %v323_v17 = vrot.slane %v302_v7, 4 }
  0x37   : > { %847 = vmatpush.bf16.msrb.mxu0 %v1239_v34  ;;  %816 = vmatmul.bf16.vlgmr.msra.gmra.mxu1 %v406_v0  ;;  %v321_v18 = vrot.slane %v320_v10, 1  ;;  %v218_v19 = vadd.f32 %v217_v11, %v216_v2  ;;  %v272_v20 = vadd.f32 %v271_v12, %v270_v3  ;;  %v378_v21 = vsel %vm356_vm0, %v353_v13, 0.0  ;;  %v1528_v34 = vld [vmem:[%s1491_s8 + $0x40] sm:$0xff]  ;;  %v1234_v3 = vld [vmem:[#allocation2 + $0x110] sm:$0xff]  ;;  %s1356_s8 = scalar_lea.hbm %s1589_s3, 2 }
  0x38   : > { %860 = vmatpush.bf16.msrb.mxu1 %v1247_v35  ;;  %v214_v24 = vadd.f32 %v213_v14, %v212_v4  ;;  %v268_v25 = vadd.f32 %v267_v15, %v266_v5  ;;  %v376_v26 = vrot.slane %v375_v16, 1  ;;  %v324_v27 = vadd.f32 %v323_v17, %v302_v7  ;;  %v1242_v4 = vld [vmem:[#allocation2 + $0x150] sm:$0xff]  ;;  %p1358_p4 = scmp.lt.s32.totalorder %s1356_s8, %s1352_s5 }
  0x39   : > { %v322_v23 = vadd.f32 %v321_v18, %v320_v10  ;;  %v219_v31 = vrot.slane %v218_v19, 1  ;;  %v273_v32 = vrot.slane %v272_v20, 1  ;;  %v379_v33 = vrot.slane %v378_v21, 4 }
  0x3a   : > { %v289_v35 = vadd.f32 %v268_v25, %v214_v24  ;;  %v377_v36 = vadd.f32 %v376_v26, %v375_v16  ;;  %v325_v37 = vrot.slane %v324_v27, 2  ;;  %v195_v38 = vunpack.c.l.bf16 %v1522_v22  ;;  %v1241_v26 = vld [vmem:[#allocation2 + $0x148] sm:$0xff]  ;;  %p1359_p7 = por %p1358_p4, %p1357_p3 }
  0x3b   : > { %848 = vmatpush.bf16.msrb.mxu0 %v1238_v54  ;;  %v220_v40 = vadd.f32 %v219_v31, %v218_v19  ;;  %v274_v41 = vadd.f32 %v273_v32, %v272_v20  ;;  %v380_v42 = vadd.f32 %v379_v33, %v378_v21  ;;  %v249_v43 = vunpack.c.l.bf16 %v1525_v28  ;;  %v1233_v21 = vld [vmem:[#allocation2 + $0x108] sm:$0xff] }
  0x3c   : > { %861 = vmatpush.bf16.msrb.mxu1 %v1246_v55  ;;  %v343_v44 = vadd.f32 %v322_v23, %v289_v35  ;;  %v326_v45 = vadd.f32 %v325_v37, %v324_v27  ;;  %v221_v46 = vrot.slane %v195_v38, 4  ;;  %v303_v47 = vunpack.c.l.bf16 %v1528_v34  ;;  %p1360_p8 = pnand %p1359_p7, %p1355_p2 }
  0x3d   : > { %v290_v48 = vadd.f32 %v274_v41, %v220_v40  ;;  %v381_v49 = vrot.slane %v380_v42, 2  ;;  %v275_v52 = vrot.slane %v249_v43, 4  ;;  %v354_v53 = vunpack.c.l.bf16 %v1532_v39 }
  0x3e   : > { %v401_v54 = vadd.f32 %v377_v36, %v343_v44  ;;  %v327_v55 = vrot.slane %v326_v45, 1  ;;  %v222_v56 = vadd.f32 %v221_v46, %v195_v38  ;;  %v329_v57 = vrot.slane %v303_v47, 4  ;;  %v1232_v38 = vld [vmem:[#allocation2 + $0x100] sm:$0xff] }
  0x3f   : > { %849 = vmatpush.bf16.msrb.mxu0 %v1237_v8  ;;  %v382_v58 = vadd.f32 %v381_v49, %v380_v42  ;;  %v276_v59 = vadd.f32 %v275_v52, %v249_v43  ;;  %v385_v60 = vsel %vm356_vm0, %v354_v53, 0.0  ;;  %v196_v61 = vunpack.c.h.bf16 %v1522_v22  ;;  %v1240_v43 = vld [vmem:[#allocation2 + $0x140] sm:$0xff] }
  0x40   : > { %862 = vmatpush.bf16.msrb.mxu1 %v1245_v9  ;;  %v407_v62 = vpack.c.bf16 %v401_v54, %v401_v54  ;;  %v328_v63 = vadd.f32 %v327_v55, %v326_v45  ;;  %v223_v0 = vrot.slane %v222_v56, 2  ;;  %v330_v1 = vadd.f32 %v329_v57, %v303_v47 }
  0x41   : > { %v383_v2 = vrot.slane %v382_v58, 1  ;;  %v277_v5 = vrot.slane %v276_v59, 2  ;;  %v386_v6 = vrot.slane %v385_v60, 4  ;;  %v227_v7 = vrot.slane %v196_v61, 4 }
  0x42   : > { %829 = vmatmul.bf16.vlgmr.msra.gmra.mxu2 %v407_v62  ;;  %v344_v8 = vadd.f32 %v328_v63, %v290_v48  ;;  %v224_v9 = vadd.f32 %v223_v0, %v222_v56  ;;  %v331_v10 = vrot.slane %v330_v1, 2  ;;  %v250_v11 = vunpack.c.h.bf16 %v1525_v28 }
  0x43   : > { %850 = vmatpush.bf16.msrb.mxu0 %v1236_v29  ;;  %v384_v12 = vadd.f32 %v383_v2, %v382_v58  ;;  %v278_v13 = vadd.f32 %v277_v5, %v276_v59  ;;  %v387_v14 = vadd.f32 %v386_v6, %v385_v60  ;;  %v228_v15 = vadd.f32 %v227_v7, %v196_v61 }
  0x44   : > { %863 = vmatpush.bf16.msrb.mxu1 %v1244_v30  ;;  %v225_v16 = vrot.slane %v224_v9, 1  ;;  %v332_v17 = vadd.f32 %v331_v10, %v330_v1  ;;  %v281_v18 = vrot.slane %v250_v11, 4  ;;  %v304_v19 = vunpack.c.h.bf16 %v1528_v34 }
  0x45   : > { %v402_v20 = vadd.f32 %v384_v12, %v344_v8  ;;  %v279_v22 = vrot.slane %v278_v13, 1  ;;  %v388_v24 = vrot.slane %v387_v14, 2  ;;  %v229_v25 = vrot.slane %v228_v15, 2 }
  0x46   : > { %v226_v27 = vadd.f32 %v225_v16, %v224_v9  ;;  %v333_v23 = vrot.slane %v332_v17, 1  ;;  %v282_v28 = vadd.f32 %v281_v18, %v250_v11  ;;  %v335_v29 = vrot.slane %v304_v19, 4  ;;  %v874_v18 = vld [vmem:[%s1588_s2] sm:$0x1] }
  0x47   : > { %851 = vmatpush.bf16.msrb.mxu0 %v1235_v50  ;;  %v408_v30 = vpack.c.bf16 %v402_v20, %v402_v20  ;;  %v280_v31 = vadd.f32 %v279_v22, %v278_v13  ;;  %v389_v32 = vadd.f32 %v388_v24, %v387_v14  ;;  %v230_v33 = vadd.f32 %v229_v25, %v228_v15 }
  0x48   : > { %864 = vmatpush.bf16.msrb.mxu1 %v1243_v51  ;;  %v334_v35 = vadd.f32 %v333_v23, %v332_v17  ;;  %v283_v36 = vrot.slane %v282_v28, 2  ;;  %v336_v37 = vadd.f32 %v335_v29, %v304_v19  ;;  %v355_v34 = vunpack.c.h.bf16 %v1532_v39 }
  0x49   : > { %842 = vmatmul.bf16.vlgmr.msra.gmra.mxu3 %v408_v30  ;;  %v291_v40 = vadd.f32 %v280_v31, %v226_v27  ;;  %v390_v41 = vrot.slane %v389_v32, 1  ;;  %v231_v42 = vrot.slane %v230_v33, 1  ;;  %v1407_v24 = vmov 128.0  }
  0x4a   : > { %v284_v44 = vadd.f32 %v283_v36, %v282_v28  ;;  %v337_v45 = vrot.slane %v336_v37, 2  ;;  %v392_v46 = vsel %vm356_vm0, %v355_v34, 0.0  ;;  %1302 = vrcp.f32 %v1407_v24 }
  0x4b   : > { %852 = vmatpush.bf16.msrb.mxu0 %v1234_v3  ;;  %v345_v47 = vadd.f32 %v334_v35, %v291_v40  ;;  %v391_v48 = vadd.f32 %v390_v41, %v389_v32  ;;  %v393_v49 = vrot.slane %v392_v46, 4  ;;  %v232_v50 = vadd.f32 %v231_v42, %v230_v33 }
  0x4c   : > { %865 = vmatpush.bf16.msrb.mxu1 %v1242_v4  ;;  %v285_v51 = vrot.slane %v284_v44, 1  ;;  %v338_v52 = vadd.f32 %v337_v45, %v336_v37  ;;  %v906_v45 = vld [vmem:[%s1588_s2 + $0x1] sm:$0x1] }
  0x4d   : > { %v403_v39 = vadd.f32 %v391_v48, %v345_v47  ;;  %v394_v53 = vadd.f32 %v393_v49, %v392_v46  ;;  %v908_v48 = vld [vmem:[%s1588_s2 + $0x2] sm:$0x1] }
  0x4e   : > { %v286_v54 = vadd.f32 %v285_v51, %v284_v44  ;;  %v339_v55 = vrot.slane %v338_v52, 1 }
  0x4f   : > { %853 = vmatpush.bf16.msrb.mxu0 %v1233_v21  ;;  %v409_v56 = vpack.c.bf16 %v403_v39, %v403_v39  ;;  %v395_v57 = vrot.slane %v394_v53, 2 }
  0x50   : > { %866 = vmatpush.bf16.msrb.mxu1 %v1241_v26  ;;  %v292_v58 = vadd.f32 %v286_v54, %v232_v50  ;;  %v340_v59 = vadd.f32 %v339_v55, %v338_v52  ;;  %v1303_v25 = vpop.eup %1302 }
  0x51   : > { %v396_v60 = vadd.f32 %v395_v57, %v394_v53  ;;  %v881_v26 = vmul.f32 128.0, %v1303_v25  ;;  %vm885_vm2 = vweird.f32 %v1303_v25 }
  0x52   : > { %v346_v61 = vadd.f32 %v340_v59, %v292_v58 }
  0x53   : > { %854 = vmatpush.bf16.msrb.mxu0 %v1232_v38  ;;  %v397_v62 = vrot.slane %v396_v60, 1  ;;  %v882_v27 = vsub.f32 1.0, %v881_v26 }
  0x54   : > { %867 = vmatpush.bf16.msrb.mxu1 %v1240_v43 }
  0x55   : > { %v398_v63 = vadd.f32 %v397_v62, %v396_v60  ;;  %v883_v23 = vmul.f32 %v1303_v25, %v882_v27 }
  0x56   : > { %855 = vmatmul.bf16.vlgmr.msrb.gmra.mxu0 %v409_v56 }
  0x57   : > { %v404_v0 = vadd.f32 %v398_v63, %v346_v61  ;;  %v884_v28 = vadd.f32 %v1303_v25, %v883_v23 }
  0x59   : > { %v410_v1 = vpack.c.bf16 %v404_v0, %v404_v0  ;;  %v886_v29 = vsel %vm885_vm2, %v1303_v25, %v884_v28 }
  0x5b   : > { %868 = vmatmul.bf16.vlgmr.msrb.gmra.mxu1 %v410_v1 }
  0xb3   : > { %v804_v2 = vpop.f32.mrf.mxu0 }
  0xb4   : > { %v817_v3 = vpop.f32.mrf.mxu1 }
  0xb5   : > { %v818_v7 = vadd.f32 %v817_v3, %v804_v2 }
  0xbb   : > { %v806_v4 = vpop.f32.mrf.mxu0 }
  0xbc   : > { %v819_v5 = vpop.f32.mrf.mxu1 }
  0xc5   : > { %v830_v6 = vpop.f32.mrf.mxu2 }
  0xc6   : > { %v831_v11 = vadd.f32 %v830_v6, %v818_v7 }
  0xcc   : > { %v843_v8 = vpop.f32.mrf.mxu3 }
  0xcd   : > { %v832_v9 = vpop.f32.mrf.mxu2  ;;  %v844_v12 = vadd.f32 %v843_v8, %v831_v11 }
  0xd3   : > { %v856_v10 = vpop.f32.mrf.mxu0 }
  0xd4   : > { %v845_v13 = vpop.f32.mrf.mxu3  ;;  %v857_v14 = vadd.f32 %v856_v10, %v844_v12 }
  0xd8   : > { %v869_v16 = vpop.f32.mrf.mxu1 }
  0xd9   : > { %v870_v17 = vadd.f32 %v869_v16, %v857_v14 }
  0xdb   : > { %v858_v15 = vpop.f32.mrf.mxu0  ;;  %v873_v19 = vmul.f32 0.037037037, %v870_v17 }
  0xdd   : > { %v875_v20 = vadd.f32 %v874_v18, %v873_v19 }
  0xdf   : > { %v877_v21 = vsel %vm876_vm1, %v875_v20, 0.0 }
  0xe0   : > { %v871_v22 = vpop.f32.mrf.mxu1  ;;  %878 = vadd.xlane.f32.xlu0 %v877_v21 }
 0x153   : > { %v879_v30 = vpop.xlane.xlu0 %878 }
 0x154   : > { %v887_v31 = vmul.f32 %v886_v29, %v879_v30 }
 0x156   : > { %v888_v32 = vsub.f32 %v875_v20, %v887_v31 }
 0x158   : > { %v889_v33 = vmul.f32 %v888_v32, %v888_v32 }
 0x15a   : > { %v890_v35 = vsel %vm876_vm1, %v889_v33, 0.0 }
 0x15b   : > { %891 = vadd.xlane.f32.xlu0 %v890_v35 }
 0x1ce   : > { %v892_v36 = vpop.xlane.xlu0 %891 }
 0x1cf   : > { %v893_v37 = vmul.f32 %v892_v36, %v886_v29 }
 0x1d1   : > { %v894_v34 = vadd.f32 1e-05, %v893_v37 }
 0x1d3   : > { %1304 = vrsqrt.f32 %v894_v34  ;;  %vm901_vm4 = vweird.f32 %v894_v34 }
 0x1d9   : > { %v1305_v38 = vpop.eup %1304 }
 0x1da   : > { %v896_v40 = vmul.f32 %v1305_v38, %v894_v34  ;;  %vm902_vm3 = vweird.f32 %v1305_v38 }
 0x1db   : > { %vm903_vm5 = vmor %vm901_vm4, %vm902_vm3 }
 0x1dc   : > { %v897_v41 = vmul.f32 %v1305_v38, %v896_v40 }
 0x1de   : > { %v898_v42 = vmul.f32 0.5, %v897_v41 }
 0x1e0   : > { %v899_v43 = vsub.f32 1.5, %v898_v42 }
 0x1e2   : > { %v900_v44 = vmul.f32 %v1305_v38, %v899_v43 }
 0x1e4   : > { %v904_v46 = vsel %vm903_vm5, %v1305_v38, %v900_v44 }
 0x1e5   : > { %v905_v47 = vmul.f32 %v904_v46, %v888_v32 }
 0x1e7   : > { %v907_v49 = vmul.f32 %v906_v45, %v905_v47 }
 0x1e9   : > { %v909_v50 = vadd.f32 %v908_v48, %v907_v49 }
 0x1eb   : > { %910 = vst [vmem:[%s179_s28] sm:$0x1] %v909_v50 }
 0x1ec   : > { %1363 = shalt.err (!%p1360_p8)
}
 0x1ed   : > { %1253 = dma.vmem_to_hbm [thread:$0]  (%p1466_p5), %s923_s29, 16, %s925_s30, %s912_s16  }
 0x1ee PF: > { %p1265_p9 = scmp.ge.s32.totalorder %s1402_s15, 2  ;;  %s936_s11 = sand.u32 1, %s1390_s12  }
 0x1ef   : > { %s937_s17 = scalar_lea.sflag [#allocation4], %s936_s11 }
 0x1f0   : > { %p1260_p10 = pnand %p1265_p9, %p1470_p6 }
 0x1f2   : > { %p1261_p11 = pneg %p1260_p10 }
 0x1f4   : > { %1385 = dma.done.wait (%p1261_p11), %s937_s17, 16  }
 0x1f5   : > { %1387 = vsyncadd (%p1261_p11), %s937_s17, 4294967280  ;;  %p14_p12 = scmp.ge.s32.totalorder %s1453_s18, 4   ;;  %s1592_s12 = smov %s1394_s13 }
 0x1f6   : > { %s1593_s13 = smov %s1398_s14  ;;  %s1594_s14 = smov %s1464_s21 }
 0x1f7   : > { %s1595_s15 = smov %s1453_s18  ;;  %16 = sbr.rel (!%p14_p12) target bundleno = 4 (0x4), region = 75 }
 0x1fc   :  { %942 = vsyncpa [#allocation3], 1 }
 0x1fd   :  { %944 = vsyncpa [#allocation3 + $0x1], 1 }
 0x1fe   :  { %945 = vsyncpa [#allocation4], 1 }
 0x1ff   :  { %947 = vsyncpa [#allocation4 + $0x1], 1 }

</bundles_post_ra>
